<compile_context>
chip_gen: v6e
topology: v6e:2x2x1
jax: 0.10.0
libtpu: 0.0.40
codegen_flags: <defaults>
</compile_context>

<pallas_src>
import jax
import jax.numpy as jnp
from jax.experimental import pallas as pl
from jax.experimental.pallas import tpu as pltpu


EPS = 1e-5  # PyTorch InstanceNorm2d default eps


# ---------------------------------------------------------------------------
# Pass 1: per-(batch) InstanceNorm statistics -> folded FMA params.
# grid = (B, phase, stats_tile); phase 0 -> norm1 moments, phase 1 -> r moments.
# Outputs (written once per batch, at the last step):
#   n1 = (Cin, 2)        : [scale1 | shift1]
#   n2 = (Cout, Cin + 1) : [W1' = diag(scale2) @ W1 | shift2]
# ---------------------------------------------------------------------------
def _make_stats_kernel(hw):
    inv_hw = 1.0 / float(hw)

    def stats_kernel(x_ref, aff1_ref, w1_ref, aff2_ref,
                     n1_ref, n2_ref,
                     sx, sxx, sr, srr, fma1):
        cin = x_ref.shape[0]
        p = pl.program_id(1)
        t = pl.program_id(2)
        last_t = pl.num_programs(2) - 1
        x = x_ref[...]                                       # (Cin, TILE) f32

        @pl.when(jnp.logical_and(p == 0, t == 0))
        def _():                                             # start of a batch
            sx[...] = jnp.zeros_like(sx)
            sxx[...] = jnp.zeros_like(sxx)
            sr[...] = jnp.zeros_like(sr)
            srr[...] = jnp.zeros_like(srr)

        @pl.when(p == 0)
        def _():                                             # norm1 moments
            sx[...] += jnp.sum(x, axis=-1, keepdims=True)
            sxx[...] += jnp.sum(x * x, axis=-1, keepdims=True)

        @pl.when(jnp.logical_and(p == 0, t == last_t))
        def _():                                             # finalize norm1 FMA
            # One-pass variance in f32; fine for roughly zero-mean audio
            # spectrograms (see correctness note in the review).
            mean1 = sx[...] * inv_hw
            var1 = jnp.maximum(sxx[...] * inv_hw - mean1 * mean1, 0.0)
            s1 = aff1_ref[:, 0:1] * jax.lax.rsqrt(var1 + EPS)
            fma1[:, 0:1] = s1
            fma1[:, 1:2] = aff1_ref[:, 1:2] - mean1 * s1

        @pl.when(p == 1)
        def _():                                             # moments of r
            r = jnp.maximum(x * fma1[:, 0:1] + fma1[:, 1:2], 0.0)
            sr[...] += jnp.sum(r, axis=-1, keepdims=True)
            for i in range(cin):                             # Cin=2: unrolled
                srr[:, i:i + 1] += jnp.sum(r * r[i:i + 1, :],
                                           axis=-1, keepdims=True)

        @pl.when(jnp.logical_and(p == 1, t == last_t))
        def _():                                             # finalize norm2 FMA
            w1 = w1_ref[...]                                 # (Cout, Cin)
            cout = w1.shape[0]
            g2 = aff2_ref[:, 0:1]
            b2 = aff2_ref[:, 1:2]
            mean_r = sr[...] * inv_hw                        # (Cin, 1)
            m_rr = srr[...] * inv_hw                         # (Cin, Cin)
            mean2 = jnp.zeros((cout, 1), jnp.float32)
            ehh = jnp.zeros((cout, 1), jnp.float32)
            for i in range(cin):                             # Cin=2: unrolled
                w1_i = w1[:, i:i + 1]                        # (Cout, 1)
                mean2 = mean2 + w1_i * mean_r[i:i + 1, :]
                a_i = jnp.zeros((cout, 1), jnp.float32)
                for j in range(cin):
                    a_i = a_i + w1[:, j:j + 1] * m_rr[j:j + 1, i:i + 1]
                ehh = ehh + w1_i * a_i
            var2 = jnp.maximum(ehh - mean2 * mean2, 0.0)
            s2 = g2 * jax.lax.rsqrt(var2 + EPS)
            # Fold the norm2 scale into conv1's weights (per batch).
            n2_ref[:, 0:cin] = s2 * w1
            n2_ref[:, cin:cin + 1] = b2 - mean2 * s2
            n1_ref[...] = fma1[...]

    return stats_kernel


# ---------------------------------------------------------------------------
# Pass 2: norm1 -> ReLU -> conv1 (scaled weights, VPU) -> +shift2 -> ReLU
#         -> conv2 (MXU, bf16 operands / f32 accumulate).
# grid = (B, spatial_tile), both axes parallel.
# ---------------------------------------------------------------------------
def _make_apply_kernel(elementwise_bf16):
    def apply_kernel(x_ref, n1_ref, n2_ref, w2_ref, o_ref):
        cin = x_ref.shape[0]
        x = x_ref[...]                                       # (Cin, TILE) f32
        # InstanceNorm1 (folded FMA) + ReLU
        r = jnp.maximum(x * n1_ref[:, 0:1] + n1_ref[:, 1:2], 0.0)
        w1p = n2_ref[:, 0:cin]                               # (Cout, Cin) = scale2*W1
        sh2 = n2_ref[:, cin:cin + 1]                         # (Cout, 1)
        if elementwise_bf16:
            # v6e/v7x: bf16 VALU packs 2x elems/vreg and drops the separate
            # astype pass before the MXU.  Do NOT use on v5e (no bf16 VALU).
            r = r.astype(jnp.bfloat16)
            w1p = w1p.astype(jnp.bfloat16)
            sh2 = sh2.astype(jnp.bfloat16)
        # Conv1 (1x1, Cin=2 -> Cout) on the VPU; norm2 scale already folded in.
        h = sh2 + w1p[:, 0:1] * r[0:1, :]                    # (Cout, TILE)
        for ci in range(1, cin):
            h = h + w1p[:, ci:ci + 1] * r[ci:ci + 1, :]
        h = jnp.maximum(h, 0.0)
        # Conv2 (1x1, Cout -> Cout) on the MXU: bf16 operands, f32 accumulate.
        out = jnp.dot(w2_ref[...], h.astype(w2_ref.dtype),
                      preferred_element_type=jnp.float32)    # (Cout, TILE)
        o_ref[...] = out.astype(o_ref.dtype)

    return apply_kernel


def _pick_tile(hw, max_tile):
    """Largest multiple of 128 that divides hw and is <= max_tile, else hw."""
    best = None
    t = 128
    while t <= min(hw, max_tile):
        if hw % t == 0:
            best = t
        t += 128
    return best if best is not None else hw


def audio_encoder(x_nchw, params, *, tile_hw=None, stats_tile_hw=None,
                  out_dtype=None, elementwise_bf16=False):
    """x_nchw: (B, Cin, H, W) float32 -> (B, Cout, H, W) out_dtype."""
    B, Cin, H, W = x_nchw.shape
    HW = H * W
    Cout = params["w2"].shape[0]
    if tile_hw is None:
        # 4096-lane apply tile: (256, 4096) f32 out double-buffered (8 MiB)
        # + f32/bf16 intermediates ~ 20 MiB, inside the 48 MiB limit below
        # and v7x's 64 MiB physical VMEM.
        tile_hw = _pick_tile(HW, 4096)
    if stats_tile_hw is None:
        # Stats pass only holds a (2, TILE) block -> make the tile huge so the
        # B*2*T grid collapses to a handful of steps per batch.
        stats_tile_hw = _pick_tile(HW, 32768)
    out_dtype = x_nchw.dtype if out_dtype is None else out_dtype
    # TODO(synk): pad/mask ragged spatial tiles instead of requiring divisibility.
    assert HW % tile_hw == 0 and (tile_hw % 128 == 0 or tile_hw == HW), tile_hw
    assert HW % stats_tile_hw == 0 and (
        stats_tile_hw % 128 == 0 or stats_tile_hw == HW), stats_tile_hw
    T = HW // tile_hw
    Ts = HW // stats_tile_hw

    x = x_nchw.reshape(B, Cin, HW)
    aff1 = jnp.concatenate([params["g1"], params["b1"]], axis=1)  # (Cin, 2)
    aff2 = jnp.concatenate([params["g2"], params["b2"]], axis=1)  # (Cout, 2)
    w2_bf16 = params["w2"].astype(jnp.bfloat16)

    # ----- pass 1: InstanceNorm statistics (touches only the Cin=2 input) -----
    n1, n2 = pl.pallas_call(
        _make_stats_kernel(HW),
        out_shape=(
            jax.ShapeDtypeStruct((B, Cin, 2), jnp.float32),        # [sc1|sh1]
            jax.ShapeDtypeStruct((B, Cout, Cin + 1), jnp.float32),  # [W1'|sh2]
        ),
        grid_spec=pltpu.PrefetchScalarGridSpec(
            num_scalar_prefetch=0,
            grid=(B, 2, Ts),
            in_specs=[
                pl.BlockSpec((None, Cin, stats_tile_hw),
                             lambda b, p, t: (b, 0, t)),
                pl.BlockSpec((Cin, 2), lambda b, p, t: (0, 0)),      # aff1
                pl.BlockSpec((Cout, Cin), lambda b, p, t: (0, 0)),   # w1
                pl.BlockSpec((Cout, 2), lambda b, p, t: (0, 0)),     # aff2
            ],
            out_specs=[
                pl.BlockSpec((None, Cin, 2), lambda b, p, t: (b, 0, 0)),
                pl.BlockSpec((None, Cout, Cin + 1), lambda b, p, t: (b, 0, 0)),
            ],
            scratch_shapes=[
                pltpu.VMEM((Cin, 1), jnp.float32),    # sum x
                pltpu.VMEM((Cin, 1), jnp.float32),    # sum x^2
                pltpu.VMEM((Cin, 1), jnp.float32),    # sum r
                pltpu.VMEM((Cin, Cin), jnp.float32),  # sum r r^T
                pltpu.VMEM((Cin, 2), jnp.float32),    # folded norm1 FMA
            ],
        ),
        compiler_params=pltpu.CompilerParams(
            dimension_semantics=("parallel", "arbitrary", "arbitrary")),
    )(x, aff1, params["w1"], aff2)

    # ----- pass 2: apply + the dominant Cout x Cout matmul, tiled over HW -----
    out = pl.pallas_call(
        _make_apply_kernel(elementwise_bf16),
        out_shape=jax.ShapeDtypeStruct((B, Cout, HW), out_dtype),
        grid_spec=pltpu.PrefetchScalarGridSpec(
            num_scalar_prefetch=0,
            grid=(B, T),
            in_specs=[
                pl.BlockSpec((None, Cin, tile_hw), lambda b, t: (b, 0, t)),
                pl.BlockSpec((None, Cin, 2), lambda b, t: (b, 0, 0)),       # n1
                pl.BlockSpec((None, Cout, Cin + 1), lambda b, t: (b, 0, 0)),  # n2
                pl.BlockSpec((Cout, Cout), lambda b, t: (0, 0)),            # w2 bf16
            ],
            out_specs=pl.BlockSpec((None, Cout, tile_hw), lambda b, t: (b, 0, t)),
        ),
        compiler_params=pltpu.CompilerParams(
            dimension_semantics=("parallel", "parallel"),
            # Above v5e's 16 MiB scoped default, well under v7x's 64 MiB VMEM.
            vmem_limit_bytes=48 * 1024 * 1024),
    )(x, n1, n2, w2_bf16)

    return out.reshape(B, Cout, H, W)


def reference_forward(x_nchw, params):
    """Pure-JAX reference mirroring the module (conv2 in bf16, f32 accumulate)."""
    B, Cin, H, W = x_nchw.shape

    def inorm(x, g, b):
        mean = jnp.mean(x, axis=(2, 3), keepdims=True)
        var = jnp.mean((x - mean) ** 2, axis=(2, 3), keepdims=True)
        xn = (x - mean) * jax.lax.rsqrt(var + EPS)
        return xn * g[None, :, None, None] + b[None, :, None, None]

    r = jnp.maximum(inorm(x_nchw, params["g1"][:, 0], params["b1"][:, 0]), 0.0)
    # conv1 (K=Cin=2) as explicit f32 FMAs (independent of XLA matmul precision).
    w1 = params["w1"]
    h = sum(r[:, i:i + 1] * w1[None, :, i, None, None] for i in range(Cin))
    h = jnp.maximum(inorm(h, params["g2"][:, 0], params["b2"][:, 0]), 0.0)
    w2 = params["w2"].astype(jnp.bfloat16)
    return jnp.einsum("oc,bchw->bohw", w2, h.astype(jnp.bfloat16),
                      preferred_element_type=jnp.float32)


def init_params(key, in_channels=2, out_channels=32):
    k1, k2, k3, k4, k5, k6 = jax.random.split(key, 6)
    # Deterministic synthetic parameters (not a checkpoint load).
    return {
        "g1": 1.0 + 0.1 * jax.random.normal(k1, (in_channels, 1), jnp.float32),
        "b1": 0.1 * jax.random.normal(k2, (in_channels, 1), jnp.float32),
        "w1": jax.random.normal(k3, (out_channels, in_channels), jnp.float32)
              / jnp.sqrt(in_channels),
        "g2": 1.0 + 0.1 * jax.random.normal(k4, (out_channels, 1), jnp.float32),
        "b2": 0.1 * jax.random.normal(k5, (out_channels, 1), jnp.float32),
        "w2": jax.random.normal(k6, (out_channels, out_channels), jnp.float32)
              / jnp.sqrt(out_channels),
    }


if __name__ == "__main__":
    key = jax.random.PRNGKey(0)
    kx, kp = jax.random.split(key)

    B, Cin, H, W = 2, 2, 16, 32   # Cin=2 is fixed by the module
    Cout = 32                     # small stand-in for the default 256

    x = jax.random.normal(kx, (B, Cin, H, W), jnp.float32)
    params = init_params(kp, in_channels=Cin, out_channels=Cout)
    ref = reference_forward(x, params)

    # Small tiles (apply 128, stats 256) exercise cross-tile statistics
    # accumulation and the tiled apply pass; production shapes use the much
    # larger defaults (4096 / 32768).
    out = audio_encoder(x, params, tile_hw=128, stats_tile_hw=256)
    out = jax.block_until_ready(out)
    assert out.shape == (B, Cout, H, W), out.shape
    assert jnp.allclose(out, ref, atol=3e-2, rtol=3e-2), (
        float(jnp.max(jnp.abs(out - ref))))

    # bf16 elementwise chain + bf16 output (the v6e/v7x configuration);
    # checked loosely against the f32-chain reference.
    out_bf16 = audio_encoder(x, params, elementwise_bf16=True,
                             out_dtype=jnp.bfloat16)
    out_bf16 = jax.block_until_ready(out_bf16)
    assert out_bf16.shape == (B, Cout, H, W), out_bf16.shape
    assert jnp.allclose(out_bf16.astype(jnp.float32), ref,
                        atol=1e-1, rtol=1e-1), (
        float(jnp.max(jnp.abs(out_bf16.astype(jnp.float32) - ref))))

    print("KERNEL_OK")
</pallas_src>

<mosaic_0001>
module attributes {stable_mosaic.version = 11 : i64} {
  func.func @stats_kernel(%arg0: i32, %arg1: i32, %arg2: i32, %arg3: memref<1x2x256xf32, #tpu.memory_space<vmem>>, %arg4: memref<2x2xf32, #tpu.memory_space<vmem>>, %arg5: memref<32x2xf32, #tpu.memory_space<vmem>>, %arg6: memref<32x2xf32, #tpu.memory_space<vmem>>, %arg7: memref<1x2x2xf32, #tpu.memory_space<vmem>>, %arg8: memref<1x32x3xf32, #tpu.memory_space<vmem>>, %arg9: memref<2x1xf32, #tpu.memory_space<vmem>>, %arg10: memref<2x1xf32, #tpu.memory_space<vmem>>, %arg11: memref<2x1xf32, #tpu.memory_space<vmem>>, %arg12: memref<2x2xf32, #tpu.memory_space<vmem>>, %arg13: memref<2x2xf32, #tpu.memory_space<vmem>>) attributes {dimension_semantics = [#tpu.dimension_semantics<parallel>, #tpu.dimension_semantics<arbitrary>, #tpu.dimension_semantics<arbitrary>], iteration_bounds = array<i64: 2, 2, 2>, scalar_prefetch = 0 : i64, scratch_operands = 5 : i64, tpu.core_type = #tpu.core_type<tc>, window_params = [{transform_indices = @transform_0, window_bounds = array<i64: 1, 2, 256>}, {pipeline_mode = #tpu.pipeline_mode<synchronous>, transform_indices = @transform_1, window_bounds = array<i64: 2, 2>}, {pipeline_mode = #tpu.pipeline_mode<synchronous>, transform_indices = @transform_2, window_bounds = array<i64: 32, 2>}, {pipeline_mode = #tpu.pipeline_mode<synchronous>, transform_indices = @transform_3, window_bounds = array<i64: 32, 2>}, {transform_indices = @transform_4, window_bounds = array<i64: 1, 2, 2>}, {transform_indices = @transform_5, window_bounds = array<i64: 1, 32, 3>}]} {
    %c0 = arith.constant 0 : index
    %c0_0 = arith.constant 0 : index
    %c0_1 = arith.constant 0 : index
    %0 = vector.load %arg3[%c0, %c0_0, %c0_1] : memref<1x2x256xf32, #tpu.memory_space<vmem>>, vector<1x2x256xf32>
    %1 = vector.shape_cast %0 : vector<1x2x256xf32> to vector<2x256xf32>
    %c0_i32 = arith.constant 0 : i32
    %2 = arith.cmpi eq, %arg1, %c0_i32 : i32
    %c0_i32_2 = arith.constant 0 : i32
    %3 = arith.cmpi eq, %arg2, %c0_i32_2 : i32
    %4 = arith.andi %2, %3 : i1
    %5 = arith.extui %4 : i1 to i32
    %c0_i32_3 = arith.constant 0 : i32
    %6 = arith.cmpi ne, %5, %c0_i32_3 : i32
    scf.if %6 {
      %cst = arith.constant 0.000000e+00 : f32
      %23 = vector.broadcast %cst : f32 to vector<2x1xf32>
      %c0_13 = arith.constant 0 : index
      %c0_14 = arith.constant 0 : index
      %24 = vector.load %arg9[%c0_13, %c0_14] : memref<2x1xf32, #tpu.memory_space<vmem>>, vector<2x1xf32>
      tpu.vector_store %arg9[%c0_13, %c0_14], %23 {strides = array<i32>} : memref<2x1xf32, #tpu.memory_space<vmem>>, vector<2x1xf32>,
      %cst_15 = arith.constant 0.000000e+00 : f32
      %25 = vector.broadcast %cst_15 : f32 to vector<2x1xf32>
      %c0_16 = arith.constant 0 : index
      %c0_17 = arith.constant 0 : index
      %26 = vector.load %arg10[%c0_16, %c0_17] : memref<2x1xf32, #tpu.memory_space<vmem>>, vector<2x1xf32>
      tpu.vector_store %arg10[%c0_16, %c0_17], %25 {strides = array<i32>} : memref<2x1xf32, #tpu.memory_space<vmem>>, vector<2x1xf32>,
      %cst_18 = arith.constant 0.000000e+00 : f32
      %27 = vector.broadcast %cst_18 : f32 to vector<2x1xf32>
      %c0_19 = arith.constant 0 : index
      %c0_20 = arith.constant 0 : index
      %28 = vector.load %arg11[%c0_19, %c0_20] : memref<2x1xf32, #tpu.memory_space<vmem>>, vector<2x1xf32>
      tpu.vector_store %arg11[%c0_19, %c0_20], %27 {strides = array<i32>} : memref<2x1xf32, #tpu.memory_space<vmem>>, vector<2x1xf32>,
      %cst_21 = arith.constant 0.000000e+00 : f32
      %29 = vector.broadcast %cst_21 : f32 to vector<2x2xf32>
      %c0_22 = arith.constant 0 : index
      %c0_23 = arith.constant 0 : index
      %30 = vector.load %arg12[%c0_22, %c0_23] : memref<2x2xf32, #tpu.memory_space<vmem>>, vector<2x2xf32>
      tpu.vector_store %arg12[%c0_22, %c0_23], %29 {strides = array<i32>} : memref<2x2xf32, #tpu.memory_space<vmem>>, vector<2x2xf32>,
    } else {
    }
    %c0_i32_4 = arith.constant 0 : i32
    %7 = arith.cmpi eq, %arg1, %c0_i32_4 : i32
    %8 = arith.extui %7 : i1 to i32
    %c0_i32_5 = arith.constant 0 : i32
    %9 = arith.cmpi ne, %8, %c0_i32_5 : i32
    scf.if %9 {
      %c0_13 = arith.constant 0 : index
      %c0_14 = arith.constant 0 : index
      %23 = vector.load %arg9[%c0_13, %c0_14] : memref<2x1xf32, #tpu.memory_space<vmem>>, vector<2x1xf32>
      %cst = arith.constant dense<0.000000e+00> : vector<2xf32>
      %24 = vector.multi_reduction <add>, %1, %cst [1] : vector<2x256xf32> to vector<2xf32>
      %25 = vector.shape_cast %24 : vector<2xf32> to vector<2x1xf32>
      %26 = arith.addf %23, %25 : vector<2x1xf32>
      %c0_15 = arith.constant 0 : index
      %c0_16 = arith.constant 0 : index
      %27 = vector.load %arg9[%c0_15, %c0_16] : memref<2x1xf32, #tpu.memory_space<vmem>>, vector<2x1xf32>
      tpu.vector_store %arg9[%c0_15, %c0_16], %26 {strides = array<i32>} : memref<2x1xf32, #tpu.memory_space<vmem>>, vector<2x1xf32>,
      %c0_17 = arith.constant 0 : index
      %c0_18 = arith.constant 0 : index
      %28 = vector.load %arg10[%c0_17, %c0_18] : memref<2x1xf32, #tpu.memory_space<vmem>>, vector<2x1xf32>
      %29 = arith.mulf %1, %1 : vector<2x256xf32>
      %cst_19 = arith.constant dense<0.000000e+00> : vector<2xf32>
      %30 = vector.multi_reduction <add>, %29, %cst_19 [1] : vector<2x256xf32> to vector<2xf32>
      %31 = vector.shape_cast %30 : vector<2xf32> to vector<2x1xf32>
      %32 = arith.addf %28, %31 : vector<2x1xf32>
      %c0_20 = arith.constant 0 : index
      %c0_21 = arith.constant 0 : index
      %33 = vector.load %arg10[%c0_20, %c0_21] : memref<2x1xf32, #tpu.memory_space<vmem>>, vector<2x1xf32>
      tpu.vector_store %arg10[%c0_20, %c0_21], %32 {strides = array<i32>} : memref<2x1xf32, #tpu.memory_space<vmem>>, vector<2x1xf32>,
    } else {
    }
    %c0_i32_6 = arith.constant 0 : i32
    %10 = arith.cmpi eq, %arg1, %c0_i32_6 : i32
    %c1_i32 = arith.constant 1 : i32
    %11 = arith.cmpi eq, %arg2, %c1_i32 : i32
    %12 = arith.andi %10, %11 : i1
    %13 = arith.extui %12 : i1 to i32
    %c0_i32_7 = arith.constant 0 : i32
    %14 = arith.cmpi ne, %13, %c0_i32_7 : i32
    scf.if %14 {
      %c0_13 = arith.constant 0 : index
      %c0_14 = arith.constant 0 : index
      %23 = vector.load %arg9[%c0_13, %c0_14] : memref<2x1xf32, #tpu.memory_space<vmem>>, vector<2x1xf32>
      %cst = arith.constant 0.001953125 : f32
      %24 = vector.broadcast %cst : f32 to vector<2x1xf32>
      %25 = arith.mulf %23, %24 : vector<2x1xf32>
      %c0_15 = arith.constant 0 : index
      %c0_16 = arith.constant 0 : index
      %26 = vector.load %arg10[%c0_15, %c0_16] : memref<2x1xf32, #tpu.memory_space<vmem>>, vector<2x1xf32>
      %cst_17 = arith.constant 0.001953125 : f32
      %27 = vector.broadcast %cst_17 : f32 to vector<2x1xf32>
      %28 = arith.mulf %26, %27 : vector<2x1xf32>
      %29 = arith.mulf %25, %25 : vector<2x1xf32>
      %30 = arith.subf %28, %29 : vector<2x1xf32>
      %cst_18 = arith.constant 0.000000e+00 : f32
      %31 = vector.broadcast %cst_18 : f32 to vector<2x1xf32>
      %32 = arith.maximumf %30, %31 : vector<2x1xf32>
      %c0_19 = arith.constant 0 : index
      %c0_20 = arith.constant 0 : index
      %33 = vector.load %arg4[%c0_19, %c0_20] : memref<2x2xf32, #tpu.memory_space<vmem>>, vector<2x1xf32>
      %cst_21 = arith.constant 9.99999974E-6 : f32
      %34 = vector.broadcast %cst_21 : f32 to vector<2x1xf32>
      %35 = arith.addf %32, %34 : vector<2x1xf32>
      %36 = math.rsqrt %35 : vector<2x1xf32>
      %37 = arith.mulf %33, %36 : vector<2x1xf32>
      %c0_22 = arith.constant 0 : index
      %c0_23 = arith.constant 0 : index
      %38 = vector.load %arg13[%c0_22, %c0_23] : memref<2x2xf32, #tpu.memory_space<vmem>>, vector<2x1xf32>
      tpu.vector_store %arg13[%c0_22, %c0_23], %37 {strides = array<i32>} : memref<2x2xf32, #tpu.memory_space<vmem>>, vector<2x1xf32>,
      %c0_24 = arith.constant 0 : index
      %c1 = arith.constant 1 : index
      %39 = vector.load %arg4[%c0_24, %c1] : memref<2x2xf32, #tpu.memory_space<vmem>>, vector<2x1xf32>
      %40 = arith.mulf %25, %37 : vector<2x1xf32>
      %41 = arith.subf %39, %40 : vector<2x1xf32>
      %c0_25 = arith.constant 0 : index
      %c1_26 = arith.constant 1 : index
      %42 = vector.load %arg13[%c0_25, %c1_26] : memref<2x2xf32, #tpu.memory_space<vmem>>, vector<2x1xf32>
      tpu.vector_store %arg13[%c0_25, %c1_26], %41 {strides = array<i32>} : memref<2x2xf32, #tpu.memory_space<vmem>>, vector<2x1xf32>,
    } else {
    }
    %c1_i32_8 = arith.constant 1 : i32
    %15 = arith.cmpi eq, %arg1, %c1_i32_8 : i32
    %16 = arith.extui %15 : i1 to i32
    %c0_i32_9 = arith.constant 0 : i32
    %17 = arith.cmpi ne, %16, %c0_i32_9 : i32
    scf.if %17 {
      %c0_13 = arith.constant 0 : index
      %c0_14 = arith.constant 0 : index
      %23 = vector.load %arg13[%c0_13, %c0_14] : memref<2x2xf32, #tpu.memory_space<vmem>>, vector<2x1xf32>
      %24 = vector.broadcast %23 : vector<2x1xf32> to vector<2x256xf32>
      %25 = arith.mulf %1, %24 : vector<2x256xf32>
      %c0_15 = arith.constant 0 : index
      %c1 = arith.constant 1 : index
      %26 = vector.load %arg13[%c0_15, %c1] : memref<2x2xf32, #tpu.memory_space<vmem>>, vector<2x1xf32>
      %27 = vector.broadcast %26 : vector<2x1xf32> to vector<2x256xf32>
      %28 = arith.addf %25, %27 : vector<2x256xf32>
      %cst = arith.constant 0.000000e+00 : f32
      %29 = vector.broadcast %cst : f32 to vector<2x256xf32>
      %30 = arith.maximumf %28, %29 : vector<2x256xf32>
      %c0_16 = arith.constant 0 : index
      %c0_17 = arith.constant 0 : index
      %31 = vector.load %arg11[%c0_16, %c0_17] : memref<2x1xf32, #tpu.memory_space<vmem>>, vector<2x1xf32>
      %cst_18 = arith.constant dense<0.000000e+00> : vector<2xf32>
      %32 = vector.multi_reduction <add>, %30, %cst_18 [1] : vector<2x256xf32> to vector<2xf32>
      %33 = vector.shape_cast %32 : vector<2xf32> to vector<2x1xf32>
      %34 = arith.addf %31, %33 : vector<2x1xf32>
      %c0_19 = arith.constant 0 : index
      %c0_20 = arith.constant 0 : index
      %35 = vector.load %arg11[%c0_19, %c0_20] : memref<2x1xf32, #tpu.memory_space<vmem>>, vector<2x1xf32>
      tpu.vector_store %arg11[%c0_19, %c0_20], %34 {strides = array<i32>} : memref<2x1xf32, #tpu.memory_space<vmem>>, vector<2x1xf32>,
      %c0_21 = arith.constant 0 : index
      %c0_22 = arith.constant 0 : index
      %36 = vector.load %arg12[%c0_21, %c0_22] : memref<2x2xf32, #tpu.memory_space<vmem>>, vector<2x1xf32>
      %37 = vector.extract_strided_slice %30 {offsets = [0, 0], sizes = [1, 256], strides = [1, 1]} : vector<2x256xf32> to vector<1x256xf32>
      %38 = vector.broadcast %37 : vector<1x256xf32> to vector<2x256xf32>
      %39 = arith.mulf %30, %38 : vector<2x256xf32>
      %cst_23 = arith.constant dense<0.000000e+00> : vector<2xf32>
      %40 = vector.multi_reduction <add>, %39, %cst_23 [1] : vector<2x256xf32> to vector<2xf32>
      %41 = vector.shape_cast %40 : vector<2xf32> to vector<2x1xf32>
      %42 = arith.addf %36, %41 : vector<2x1xf32>
      %c0_24 = arith.constant 0 : index
      %c0_25 = arith.constant 0 : index
      %43 = vector.load %arg12[%c0_24, %c0_25] : memref<2x2xf32, #tpu.memory_space<vmem>>, vector<2x1xf32>
      tpu.vector_store %arg12[%c0_24, %c0_25], %42 {strides = array<i32>} : memref<2x2xf32, #tpu.memory_space<vmem>>, vector<2x1xf32>,
      %c0_26 = arith.constant 0 : index
      %c1_27 = arith.constant 1 : index
      %44 = vector.load %arg12[%c0_26, %c1_27] : memref<2x2xf32, #tpu.memory_space<vmem>>, vector<2x1xf32>
      %45 = vector.extract_strided_slice %30 {offsets = [1, 0], sizes = [1, 256], strides = [1, 1]} : vector<2x256xf32> to vector<1x256xf32>
      %46 = vector.broadcast %45 : vector<1x256xf32> to vector<2x256xf32>
      %47 = arith.mulf %30, %46 : vector<2x256xf32>
      %cst_28 = arith.constant dense<0.000000e+00> : vector<2xf32>
      %48 = vector.multi_reduction <add>, %47, %cst_28 [1] : vector<2x256xf32> to vector<2xf32>
      %49 = vector.shape_cast %48 : vector<2xf32> to vector<2x1xf32>
      %50 = arith.addf %44, %49 : vector<2x1xf32>
      %c0_29 = arith.constant 0 : index
      %c1_30 = arith.constant 1 : index
      %51 = vector.load %arg12[%c0_29, %c1_30] : memref<2x2xf32, #tpu.memory_space<vmem>>, vector<2x1xf32>
      tpu.vector_store %arg12[%c0_29, %c1_30], %50 {strides = array<i32>} : memref<2x2xf32, #tpu.memory_space<vmem>>, vector<2x1xf32>,
    } else {
    }
    %c1_i32_10 = arith.constant 1 : i32
    %18 = arith.cmpi eq, %arg1, %c1_i32_10 : i32
    %c1_i32_11 = arith.constant 1 : i32
    %19 = arith.cmpi eq, %arg2, %c1_i32_11 : i32
    %20 = arith.andi %18, %19 : i1
    %21 = arith.extui %20 : i1 to i32
    %c0_i32_12 = arith.constant 0 : i32
    %22 = arith.cmpi ne, %21, %c0_i32_12 : i32
    scf.if %22 {
      %c0_13 = arith.constant 0 : index
      %c0_14 = arith.constant 0 : index
      %23 = vector.load %arg5[%c0_13, %c0_14] : memref<32x2xf32, #tpu.memory_space<vmem>>, vector<32x2xf32>
      %c0_15 = arith.constant 0 : index
      %c0_16 = arith.constant 0 : index
      %24 = vector.load %arg6[%c0_15, %c0_16] : memref<32x2xf32, #tpu.memory_space<vmem>>, vector<32x1xf32>
      %c0_17 = arith.constant 0 : index
      %c1 = arith.constant 1 : index
      %25 = vector.load %arg6[%c0_17, %c1] : memref<32x2xf32, #tpu.memory_space<vmem>>, vector<32x1xf32>
      %c0_18 = arith.constant 0 : index
      %c0_19 = arith.constant 0 : index
      %26 = vector.load %arg11[%c0_18, %c0_19] : memref<2x1xf32, #tpu.memory_space<vmem>>, vector<2x1xf32>
      %cst = arith.constant 0.001953125 : f32
      %27 = vector.broadcast %cst : f32 to vector<2x1xf32>
      %28 = arith.mulf %26, %27 : vector<2x1xf32>
      %c0_20 = arith.constant 0 : index
      %c0_21 = arith.constant 0 : index
      %29 = vector.load %arg12[%c0_20, %c0_21] : memref<2x2xf32, #tpu.memory_space<vmem>>, vector<2x2xf32>
      %cst_22 = arith.constant 0.001953125 : f32
      %30 = vector.broadcast %cst_22 : f32 to vector<2x2xf32>
      %31 = arith.mulf %29, %30 : vector<2x2xf32>
      %cst_23 = arith.constant 0.000000e+00 : f32
      %32 = vector.broadcast %cst_23 : f32 to vector<32x1xf32>
      %cst_24 = arith.constant 0.000000e+00 : f32
      %33 = vector.broadcast %cst_24 : f32 to vector<32x1xf32>
      %34 = vector.extract_strided_slice %23 {offsets = [0, 0], sizes = [32, 1], strides = [1, 1]} : vector<32x2xf32> to vector<32x1xf32>
      %35 = vector.extract_strided_slice %28 {offsets = [0, 0], sizes = [1, 1], strides = [1, 1]} : vector<2x1xf32> to vector<1x1xf32>
      %36 = vector.broadcast %35 : vector<1x1xf32> to vector<32x1xf32>
      %37 = arith.mulf %34, %36 : vector<32x1xf32>
      %38 = arith.addf %32, %37 : vector<32x1xf32>
      %cst_25 = arith.constant 0.000000e+00 : f32
      %39 = vector.broadcast %cst_25 : f32 to vector<32x1xf32>
      %40 = vector.extract_strided_slice %23 {offsets = [0, 0], sizes = [32, 1], strides = [1, 1]} : vector<32x2xf32> to vector<32x1xf32>
      %41 = vector.extract_strided_slice %31 {offsets = [0, 0], sizes = [1, 1], strides = [1, 1]} : vector<2x2xf32> to vector<1x1xf32>
      %42 = vector.broadcast %41 : vector<1x1xf32> to vector<32x1xf32>
      %43 = arith.mulf %40, %42 : vector<32x1xf32>
      %44 = arith.addf %39, %43 : vector<32x1xf32>
      %45 = vector.extract_strided_slice %23 {offsets = [0, 1], sizes = [32, 1], strides = [1, 1]} : vector<32x2xf32> to vector<32x1xf32>
      %46 = vector.extract_strided_slice %31 {offsets = [1, 0], sizes = [1, 1], strides = [1, 1]} : vector<2x2xf32> to vector<1x1xf32>
      %47 = vector.broadcast %46 : vector<1x1xf32> to vector<32x1xf32>
      %48 = arith.mulf %45, %47 : vector<32x1xf32>
      %49 = arith.addf %44, %48 : vector<32x1xf32>
      %50 = arith.mulf %34, %49 : vector<32x1xf32>
      %51 = arith.addf %33, %50 : vector<32x1xf32>
      %52 = vector.extract_strided_slice %23 {offsets = [0, 1], sizes = [32, 1], strides = [1, 1]} : vector<32x2xf32> to vector<32x1xf32>
      %53 = vector.extract_strided_slice %28 {offsets = [1, 0], sizes = [1, 1], strides = [1, 1]} : vector<2x1xf32> to vector<1x1xf32>
      %54 = vector.broadcast %53 : vector<1x1xf32> to vector<32x1xf32>
      %55 = arith.mulf %52, %54 : vector<32x1xf32>
      %56 = arith.addf %38, %55 : vector<32x1xf32>
      %cst_26 = arith.constant 0.000000e+00 : f32
      %57 = vector.broadcast %cst_26 : f32 to vector<32x1xf32>
      %58 = vector.extract_strided_slice %23 {offsets = [0, 0], sizes = [32, 1], strides = [1, 1]} : vector<32x2xf32> to vector<32x1xf32>
      %59 = vector.extract_strided_slice %31 {offsets = [0, 1], sizes = [1, 1], strides = [1, 1]} : vector<2x2xf32> to vector<1x1xf32>
      %60 = vector.broadcast %59 : vector<1x1xf32> to vector<32x1xf32>
      %61 = arith.mulf %58, %60 : vector<32x1xf32>
      %62 = arith.addf %57, %61 : vector<32x1xf32>
      %63 = vector.extract_strided_slice %23 {offsets = [0, 1], sizes = [32, 1], strides = [1, 1]} : vector<32x2xf32> to vector<32x1xf32>
      %64 = vector.extract_strided_slice %31 {offsets = [1, 1], sizes = [1, 1], strides = [1, 1]} : vector<2x2xf32> to vector<1x1xf32>
      %65 = vector.broadcast %64 : vector<1x1xf32> to vector<32x1xf32>
      %66 = arith.mulf %63, %65 : vector<32x1xf32>
      %67 = arith.addf %62, %66 : vector<32x1xf32>
      %68 = arith.mulf %52, %67 : vector<32x1xf32>
      %69 = arith.addf %51, %68 : vector<32x1xf32>
      %70 = arith.mulf %56, %56 : vector<32x1xf32>
      %71 = arith.subf %69, %70 : vector<32x1xf32>
      %cst_27 = arith.constant 0.000000e+00 : f32
      %72 = vector.broadcast %cst_27 : f32 to vector<32x1xf32>
      %73 = arith.maximumf %71, %72 : vector<32x1xf32>
      %cst_28 = arith.constant 9.99999974E-6 : f32
      %74 = vector.broadcast %cst_28 : f32 to vector<32x1xf32>
      %75 = arith.addf %73, %74 : vector<32x1xf32>
      %76 = math.rsqrt %75 : vector<32x1xf32>
      %77 = arith.mulf %24, %76 : vector<32x1xf32>
      %78 = vector.broadcast %77 : vector<32x1xf32> to vector<32x2xf32>
      %79 = arith.mulf %78, %23 : vector<32x2xf32>
      %c0_29 = arith.constant 0 : index
      %c0_30 = arith.constant 0 : index
      %c0_31 = arith.constant 0 : index
      %80 = vector.load %arg8[%c0_29, %c0_30, %c0_31] : memref<1x32x3xf32, #tpu.memory_space<vmem>>, vector<1x32x2xf32>
      %81 = vector.shape_cast %80 : vector<1x32x2xf32> to vector<32x2xf32>
      %82 = vector.shape_cast %79 : vector<32x2xf32> to vector<1x32x2xf32>
      tpu.vector_store %arg8[%c0_29, %c0_30, %c0_31], %82 {strides = array<i32>} : memref<1x32x3xf32, #tpu.memory_space<vmem>>, vector<1x32x2xf32>,
      %83 = arith.mulf %56, %77 : vector<32x1xf32>
      %84 = arith.subf %25, %83 : vector<32x1xf32>
      %c0_32 = arith.constant 0 : index
      %c0_33 = arith.constant 0 : index
      %c2 = arith.constant 2 : index
      %85 = vector.load %arg8[%c0_32, %c0_33, %c2] : memref<1x32x3xf32, #tpu.memory_space<vmem>>, vector<1x32x1xf32>
      %86 = vector.shape_cast %85 : vector<1x32x1xf32> to vector<32x1xf32>
      %87 = vector.shape_cast %84 : vector<32x1xf32> to vector<1x32x1xf32>
      tpu.vector_store %arg8[%c0_32, %c0_33, %c2], %87 {strides = array<i32>} : memref<1x32x3xf32, #tpu.memory_space<vmem>>, vector<1x32x1xf32>,
      %c0_34 = arith.constant 0 : index
      %c0_35 = arith.constant 0 : index
      %88 = vector.load %arg13[%c0_34, %c0_35] : memref<2x2xf32, #tpu.memory_space<vmem>>, vector<2x2xf32>
      %c0_36 = arith.constant 0 : index
      %c0_37 = arith.constant 0 : index
      %c0_38 = arith.constant 0 : index
      %89 = vector.load %arg7[%c0_36, %c0_37, %c0_38] : memref<1x2x2xf32, #tpu.memory_space<vmem>>, vector<1x2x2xf32>
      %90 = vector.shape_cast %89 : vector<1x2x2xf32> to vector<2x2xf32>
      %91 = vector.shape_cast %88 : vector<2x2xf32> to vector<1x2x2xf32>
      tpu.vector_store %arg7[%c0_36, %c0_37, %c0_38], %91 {strides = array<i32>} : memref<1x2x2xf32, #tpu.memory_space<vmem>>, vector<1x2x2xf32>,
    } else {
    }
    return
  }
  func.func @transform_0(%arg0: i32, %arg1: i32, %arg2: i32) -> (i32, i32, i32) {
    %c0_i32 = arith.constant 0 : i32
    %c0_i32_0 = arith.constant 0 : i32
    return %arg0, %c0_i32, %arg2 : i32, i32, i32
  }
  func.func @transform_1(%arg0: i32, %arg1: i32, %arg2: i32) -> (i32, i32) {
    %c0_i32 = arith.constant 0 : i32
    %c0_i32_0 = arith.constant 0 : i32
    %c0_i32_1 = arith.constant 0 : i32
    return %c0_i32, %c0_i32_0 : i32, i32
  }
  func.func @transform_2(%arg0: i32, %arg1: i32, %arg2: i32) -> (i32, i32) {
    %c0_i32 = arith.constant 0 : i32
    %c0_i32_0 = arith.constant 0 : i32
    %c0_i32_1 = arith.constant 0 : i32
    return %c0_i32, %c0_i32_0 : i32, i32
  }
  func.func @transform_3(%arg0: i32, %arg1: i32, %arg2: i32) -> (i32, i32) {
    %c0_i32 = arith.constant 0 : i32
    %c0_i32_0 = arith.constant 0 : i32
    %c0_i32_1 = arith.constant 0 : i32
    return %c0_i32, %c0_i32_0 : i32, i32
  }
  func.func @transform_4(%arg0: i32, %arg1: i32, %arg2: i32) -> (i32, i32, i32) {
    %c0_i32 = arith.constant 0 : i32
    %c0_i32_0 = arith.constant 0 : i32
    %c0_i32_1 = arith.constant 0 : i32
    return %arg0, %c0_i32, %c0_i32_0 : i32, i32, i32
  }
  func.func @transform_5(%arg0: i32, %arg1: i32, %arg2: i32) -> (i32, i32, i32) {
    %c0_i32 = arith.constant 0 : i32
    %c0_i32_0 = arith.constant 0 : i32
    %c0_i32_1 = arith.constant 0 : i32
    return %arg0, %c0_i32, %c0_i32_0 : i32, i32, i32
  }
}

</mosaic_0001>

<bundles_post_ra>
// kernel: tpu_custom_call.1
= control target key start
LH: loop header
LB: loop body
LE: loop exit
PB: predicated region body
PF: predicated region fallthrough
CT: control target
= control target key end

     0   :  { %11 = vsyncpa [#allocation8], 0  ;;  %s1508_s0 = inlined_call_operand.vmem [shape: f32[2,2,512], index: 0, kind: input, shape index: {}]   ;;  %s1509_s1 = inlined_call_operand.vmem [shape: f32[2,2], index: 1, kind: input, shape index: {}]   ;;  %s1510_s2 = inlined_call_operand.vmem [shape: f32[32,2], index: 2, kind: input, shape index: {}]   ;;  %s1511_s3 = inlined_call_operand.vmem [shape: f32[32,2], index: 3, kind: input, shape index: {}]   ;;  %s1512_s4 = inlined_call_operand.hbm [shape: f32[2,2,2], index: 4, kind: output, shape index: {0}]   ;;  %s1513_s5 = inlined_call_operand.vmem [shape: f32[2,32,3], index: 5, kind: output, shape index: {1}]  }
   0x1   :  { %13 = vsyncpa [#allocation8 + $0x1], 0  ;;  %s1204_s18 = smov 0   ;;  %s1206_s19 = smov 0  }
   0x2   :  { %s1208_s20 = smov 0   ;;  %s1210_s21 = smov 0  }
   0x3   :  { %s1212_s22 = smov 0   ;;  %s1214_s23 = smov 0  }
   0x4   :  { %s1216_s24 = smov 0   ;;  %s1218_s25 = smov 0  }
   0x5   :  { %s1220_s26 = smov 0   ;;  %s1222_s27 = smov 0  }
   0x6 LB: > { %1518 = sst [smem:[#allocation10_spill]] %s1153_s25  ;;  %s924_s28 = sadd.s32 4294967295, %s1161_s27   ;;  %s1161_s27 = sphi %s1222_s27, %s19_s27   ;;  %s1157_s26 = sphi %s1220_s26, %s1530_s26   ;;  %s1153_s25 = sphi %s1218_s25, %s1529_s25   ;;  %s1149_s24 = sphi %s1216_s24, %s1535_s24   ;;  %s1145_s23 = sphi %s1214_s23, %s1527_s23   ;;  %s1141_s22 = sphi %s1212_s22, %s1526_s22   ;;  %s1137_s21 = sphi %s1210_s21, %s1534_s21   ;;  %s1133_s20 = sphi %s1208_s20, %s1533_s20   ;;  %s1129_s19 = sphi %s1206_s19, %s1532_s19   ;;  %s1125_s18 = sphi %s1204_s18, %s1531_s18  }
   0x7   : > { %1519 = sst [smem:[#allocation11_spill]] %s1157_s26  ;;  %s925_s29 = sadd.s32 4294967294, %s1161_s27  }
   0x8   : > { %s31_s30 = sadd.s32 1, %s1149_s24  ;;  %s34_s6 = sadd.s32 1, %s1153_s25 }
   0x9   : > { %p32_p0 = scmp.ge.s32.totalorder %s31_s30, 2  ;;  %s38_s7 = sadd.s32 1, %s1157_s26 }
   0xa   : > { %p146_p1 = scmp.ne.s32.totalorder %s1133_s20, %s1129_s19  ;;  %p147_p2 = scmp.eq.s32.totalorder %s924_s28, 7 }
   0xb   : > { %s1537_s30 = smov (%p32_p0, %s31_s30), 0  ;;  %s1539_s6 = smov (!%p32_p0, %s34_s6), %s1153_s25 }
   0xc   : > { %1520 = sst [smem:[#allocation12_spill]] %s1537_s30  ;;  %p152_p3 = scmp.ne.s32.totalorder %s1129_s19, %s1125_s18 }
   0xd   : > { %p36_p4 = scmp.ge.s32.totalorder %s1539_s6, 2  ;;  %p153_p5 = scmp.eq.s32.totalorder %s925_s29, 7 }
   0xe   : > { %p1266_p6 = por %p147_p2, %p146_p1  ;;  %p928_p7 = scmp.ge.s32.totalorder %s1161_s27, 1 }
   0xf   : > { %s1541_s6 = smov (%p36_p4, %s1539_s6), 0  ;;  %s1543_s7 = smov (!%p36_p4, %s38_s7), %s1157_s26 }
  0x10   : > { %1522 = sst [smem:[#allocation13_spill]] %s1541_s6  ;;  %p1274_p8 = por %p153_p5, %p152_p3 }
  0x11   : > { %p219_p9 = scmp.lt.s32.totalorder %s1161_s27, 9  ;;  %p40_p10 = scmp.ge.s32.totalorder %s1543_s7, 2 }
  0x12   : > { %s136_s11 = sadd.s32 1, %s1133_s20 }
  0x13   : > { %p220_p11 = pnand %p928_p7, %p219_p9  ;;  %s1545_s7 = smov (%p40_p10, %s1543_s7), 0 }
  0x14   : > { %1524 = sst [smem:[#allocation14_spill]] %s1545_s7  ;;  %s133_s10 = ssub.s32 %s1157_s26, %s1545_s7 }
  0x15   : > { %p134_p12 = scmp.eq.s32.totalorder %s133_s10, 0  ;;  %223 = sbr.rel (%p220_p11) target bundleno = 1331 (0x533), region = 36 }
  0x16   : > { %s1516_s13 = sand.u32 (!%p220_p11), 1, %s1129_s19   ;;  %s930_s14 = sshll.u32 (!%p220_p11), %s1137_s21, 1 }
  0x17   : > { %s1285_s12 = scalar_select %p134_p12, %s1133_s20, %s136_s11  }
  0x18   : > { %s1291_s15 = sshll.u32 (!%p220_p11), %s1516_s13, 1  ;;  %p257_p13 = scmp.lt.s32.totalorder (!%p220_p11), %s1145_s23, 1 }
  0x19   : > { %p259_p0 = scmp.lt.s32.totalorder (!%p220_p11), %s930_s14, 3  ;;  %p272_p1 = scmp.eq.s32.totalorder (!%p220_p11), %s1141_s22, 0 }
  0x1a   : > { %s258_s16 = scalar_select %p257_p13, %s1145_s23, 1 }
  0x1b   : > { %s1547_s14 = smov (!%p259_p0, %s930_s14), 3  ;;  %p273_p2 = scmp.eq.s32.totalorder %s1137_s21, 0 }
  0x1c   : > { %s931_s17 = sshll.u32 %s258_s16, 2  ;;  %s941_s28 = sshll.u32 %s258_s16, 5 }
  0x1d   : > { %s262_s29 = sadd.s32 %s931_s17, %s1547_s14  ;;  %s1298_s7 = scalar_lea.vmem %s1513_s5, %s941_s28 }
  0x1e   : > { %s932_s6 = sshll.u32 %s262_s29, 1  ;;  %p274_p3 = pnand %p273_p2, %p272_p1 }
  0x1f   : > { %s264_s13 = scalar_lea.vmem %s1508_s0, %s932_s6  ;;  %s248_s25 = scalar_lea.vmem [#allocation7], %s1291_s15 }
  0x20   : > { %v1305_v0 = vld [vmem:[%s264_s13] sm:$0xf]  ;;  %277 = sbr.rel (%p274_p3) target bundleno = 41 (0x29), region = 40 }
  0x25   : > { %vm278_vm0 = vcmask 1024   ;;  %vm282_vm1 = vcmask 9216   ;;  %v1163_v1 = vmov 0.0  }
  0x26   : > { %279 = vst.msk [vmem:[#allocation2] sm:$0x3] %vm278_vm0, %v1163_v1  ;;  %280 = vst.msk [vmem:[#allocation3] sm:$0x3] %vm278_vm0, %v1163_v1 }
  0x27   : > { %281 = vst.msk [vmem:[#allocation4] sm:$0x3] %vm278_vm0, %v1163_v1 }
  0x28   : > { %283 = vst.msk [vmem:[#allocation5] sm:$0x3] %vm282_vm1, %v1163_v1 }
  0x29 PF: > { %p935_p4 = scmp.ne.s32.totalorder %s1141_s22, 0 }
  0x2b   : > { %286 = sbr.rel (%p935_p4) target bundleno = 207 (0xcf), region = 44 }
  0x30   : > { %v292_v2 = vlaneseq  ;;  %v1164_v3 = vmov 1983009808   ;;  %v309_v7 = vmul.f32 %v1305_v0, %v1305_v0  ;;  %vm299_vm2 = vcmask 1041408   ;;  %v287_v19 = vld [vmem:[#allocation2] sm:$0x3] }
  0x31   : > { %v290_v4 = vunpack.c.l.s4 %v1164_v3  ;;  %vm306_vm3 = vcmask 1024   ;;  %v308_v22 = vld [vmem:[#allocation3] sm:$0x3] }
  0x32   : > { %v293_v5 = vshrl.u32 %v292_v2, 7 }
  0x33   : > { %v291_v6 = vunpack.c.0.s8 %v290_v4 }
  0x35   : > { %v294_v8 = vsub.s32 %v291_v6, %v293_v5 }
  0x37   : > { %v295_v9 = vrot.slane %v1305_v0, %v294_v8  ;;  %v317_v10 = vrot.slane %v309_v7, %v294_v8 }
  0x39   : > { %v296_v11 = vcombine.high %v295_v9, %v295_v9  ;;  %v300_v12 = vsel %vm299_vm2, %v295_v9, 0.0  ;;  %v318_v13 = vcombine.high %v317_v10, %v317_v10  ;;  %v321_v15 = vsel %vm299_vm2, %v317_v10, 0.0 }
  0x3b   : > { %v301_v14 = vsel %vm299_vm2, %v296_v11, 0.0  ;;  %v322_v16 = vsel %vm299_vm2, %v318_v13, 0.0 }
  0x3c   : > { %v302_v17 = vadd.f32 %v301_v14, %v300_v12  ;;  %v323_v18 = vadd.f32 %v322_v16, %v321_v15 }
  0x3e   : > { %303 = vadd.xlane.f32.xlu0 %v302_v17 }
  0x42   : > { %324 = vadd.xlane.f32.xlu0 %v323_v18 }
  0xc7   : > { %v304_v20 = vpop.xlane.xlu0 %303 }
  0xc8   : > { %v305_v21 = vadd.f32 %v304_v20, %v287_v19 }
  0xca   : > { %307 = vst.msk [vmem:[#allocation2] sm:$0x3] %vm306_vm3, %v305_v21 }
  0xcb   : > { %v325_v23 = vpop.xlane.xlu0 %324 }
  0xcc   : > { %v326_v24 = vadd.f32 %v325_v23, %v308_v22 }
  0xce   : > { %327 = vst.msk [vmem:[#allocation3] sm:$0x3] %vm306_vm3, %v326_v24 }
  0xcf PF: > { %p328_p5 = scmp.eq.s32.totalorder %s1137_s21, 1 }
  0xd1   : > { %p329_p7 = pnand %p328_p5, %p272_p1 }
  0xd2   : > { %s1165_s6 = smov (!%p329_p7), 1  }
  0xd3   : > { %332 = sbr.rel (%p329_p7) target bundleno = 363 (0x16b), region = 48 }
  0xd8   : > { %v333_v25 = vld [vmem:[#allocation2] sm:$0x3]  ;;  %v335_v26 = vld [vmem:[#allocation3] sm:$0x3]  ;;  %vm344_vm4 = vcmask 1024   ;;  %vm353_vm5 = vcmask 9224  }
  0xd9   : > { %v334_v27 = vmul.f32 0.001953125, %v333_v25  ;;  %v336_v28 = vmul.f32 0.001953125, %v335_v26  ;;  %v340_v33 = vld [vmem:[%s1509_s1] sm:$0x3] }
  0xda   : > { %v346_v37 = vld [vmem:[%s1509_s1] sm:$0x3] }
  0xdb   : > { %v337_v29 = vmul.f32 %v334_v27, %v334_v27 }
  0xdd   : > { %v338_v30 = vsub.f32 %v336_v28, %v337_v29 }
  0xdf   : > { %v339_v31 = vmax.f32 %v338_v30, 0.0 }
  0xe1   : > { %v341_v32 = vadd.f32 1e-05, %v339_v31 }
  0xe3   : > { %1039 = vrsqrt.f32 %v341_v32 }
  0xf0   : > { %v1040_v34 = vpop.eup %1039 }
  0xf1   : > { %v343_v35 = vmul.f32 %v1040_v34, %v340_v33 }
  0xf3   : > { %345 = vst.msk [vmem:[#allocation6] sm:$0x3] %vm344_vm4, %v343_v35  ;;  %v347_v36 = vmul.f32 %v343_v35, %v334_v27 }
  0xf5   : > { %349 = vrot.lane.b32.xlu0 %v347_v36, %s1165_s6 }
 0x167   : > { %v350_v38 = vpop.permute.xlu0 %349 }
 0x168   : > { %v352_v39 = vsub.f32 %v346_v37, %v350_v38 }
 0x16a   : > { %354 = vst.msk [vmem:[#allocation6] sm:$0x3] %vm353_vm5, %v352_v39 }
 0x16b PF: > { %p355_p9 = scmp.eq.s32.totalorder %s1141_s22, 1  ;;  %p936_p10 = scmp.ne.s32.totalorder %s1141_s22, 1 }
 0x16d   : > { %358 = sbr.rel (%p936_p10) target bundleno = 675 (0x2a3), region = 52 }
 0x172   : > { %v359_v40 = vld [vmem:[#allocation6] sm:$0x3]  ;;  %v1166_v41 = vmov 0   ;;  %v1167_v42 = vmov 1   ;;  %v1168_v43 = vmov 269488144   ;;  %v367_v45 = vlaneseq }
 0x173   : > { %1041 = vset.pattern.permute.xlu0 %v1166_v41  ;;  %v365_v44 = vunpack.c.l.s4 %v1168_v43  ;;  %v1169_v54 = vmov 1983009808   ;;  %vm398_vm6 = vcmask 1041408   ;;  %v407_v29 = vld [vmem:[#allocation5] sm:$0x3]  ;;  %vm405_vm7 = vcmask 1024  }
 0x174   : > { %362 = vperm.xlu0 %1041, %v359_v40   ;;  %v368_v47 = vshrl.u32 %v367_v45, 7  ;;  %v389_v55 = vunpack.c.l.s4 %v1169_v54  ;;  %v386_v32 = vld [vmem:[#allocation4] sm:$0x3]  ;;  %vm504_vm8 = vcmask 9224  }
 0x175   : > { %v366_v46 = vunpack.c.0.s8 %v365_v44 }
 0x176   : > { %v410_v57 = vsub.s32 0, %v368_v47  ;;  %v414_v58 = vsub.s32 2, %v368_v47  ;;  %v459_v59 = vsub.s32 1, %v368_v47  ;;  %v463_v60 = vsub.s32 3, %v368_v47 }
 0x177   : > { %v369_v48 = vsub.s32 %v366_v46, %v368_v47  ;;  %v390_v62 = vunpack.c.0.s8 %v389_v55 }
 0x178   : > { %1042 = vset.pattern.permute.xlu0 %v1167_v42 }
 0x179   : > { %374 = vperm.xlu0 %1042, %v359_v40   ;;  %v393_v8 = vsub.s32 %v390_v62, %v368_v47 }
 0x1ef   : > { %v363_v49 = vpop.permute.xlu0 %362 }
 0x1f0   : > { %v370_v50 = vrot.slane %v363_v49, %v369_v48 }
 0x1f2   : > { %v372_v52 = vmul.f32 %v370_v50, %v1305_v0 }
 0x1f4   : > { %v375_v51 = vpop.permute.xlu0 %374 }
 0x1f5   : > { %v382_v53 = vrot.slane %v375_v51, %v369_v48 }
 0x1f7   : > { %v384_v56 = vadd.f32 %v382_v53, %v372_v52 }
 0x1f9   : > { %v385_v61 = vmax.f32 %v384_v56, 0.0 }
 0x1fb   : > { %v411_v63 = vrot.slane %v385_v61, %v410_v57  ;;  %v415_v1 = vrot.slane %v385_v61, %v414_v58  ;;  %v460_v2 = vrot.slane %v385_v61, %v459_v59  ;;  %v464_v3 = vrot.slane %v385_v61, %v463_v60 }
 0x1fc   : > { %v394_v13 = vrot.slane %v385_v61, %v393_v8 }
 0x1fd   : > { %v421_v4 = vrot.slane %v411_v63, %v410_v57  ;;  %v425_v5 = vrot.slane %v415_v1, %v410_v57  ;;  %v470_v6 = vrot.slane %v460_v2, %v459_v59  ;;  %v474_v7 = vrot.slane %v464_v3, %v459_v59 }
 0x1fe   : > { %v395_v17 = vcombine.high %v394_v13, %v394_v13  ;;  %v399_v24 = vsel %vm398_vm6, %v394_v13, 0.0 }
 0x1ff   : > { %v428_v0 = vcombine.low %v421_v4, %v425_v5  ;;  %v477_v9 = vcombine.low %v470_v6, %v474_v7 }
 0x200   : > { %v400_v22 = vsel %vm398_vm6, %v395_v17, 0.0 }
 0x201   : > { %v435_v10 = vrot.slane %v428_v0, %v393_v8  ;;  %v484_v11 = vrot.slane %v477_v9, %v393_v8  ;;  %v401_v25 = vadd.f32 %v400_v22, %v399_v24 }
 0x203   : > { %v437_v12 = vmul.f32 %v435_v10, %v385_v61  ;;  %v486_v14 = vmul.f32 %v484_v11, %v385_v61 }
 0x205   : > { %v445_v15 = vrot.slane %v437_v12, %v393_v8  ;;  %v494_v18 = vrot.slane %v486_v14, %v393_v8 }
 0x207   : > { %v446_v16 = vcombine.high %v445_v15, %v445_v15  ;;  %v449_v19 = vsel %vm398_vm6, %v445_v15, 0.0  ;;  %v495_v23 = vcombine.high %v494_v18, %v494_v18  ;;  %v498_v27 = vsel %vm398_vm6, %v494_v18, 0.0 }
 0x209   : > { %v450_v20 = vsel %vm398_vm6, %v446_v16, 0.0  ;;  %v499_v26 = vsel %vm398_vm6, %v495_v23, 0.0 }
 0x20a   : > { %v451_v21 = vadd.f32 %v450_v20, %v449_v19  ;;  %v500_v28 = vadd.f32 %v499_v26, %v498_v27 }
 0x20c   : > { %452 = vadd.xlane.f32.xlu1 %v451_v21 }
 0x210   : > { %402 = vadd.xlane.f32.xlu1 %v401_v25 }
 0x214   : > { %501 = vadd.xlane.f32.xlu1 %v500_v28 }
 0x295   : > { %v453_v30 = vpop.xlane.xlu1 %452 }
 0x296   : > { %v454_v31 = vadd.f32 %v453_v30, %v407_v29 }
 0x298   : > { %455 = vst.msk [vmem:[#allocation5] sm:$0x3] %vm405_vm7, %v454_v31 }
 0x299   : > { %v403_v33 = vpop.xlane.xlu1 %402 }
 0x29a   : > { %v404_v34 = vadd.f32 %v403_v33, %v386_v32 }
 0x29c   : > { %406 = vst.msk [vmem:[#allocation4] sm:$0x3] %vm405_vm7, %v404_v34 }
 0x29d   : > { %v502_v36 = vpop.xlane.xlu1 %501 }
 0x29f   : > { %v456_v35 = vld [vmem:[#allocation5] sm:$0x3] }
 0x2a0   : > { %v503_v37 = vadd.f32 %v502_v36, %v456_v35 }
 0x2a2   : > { %505 = vst.msk [vmem:[#allocation5] sm:$0x3] %vm504_vm8, %v503_v37 }
 0x2a3 PF: > { %p506_p11 = pnand %p355_p9, %p328_p5 }
 0x2a4   : > { %s1170_s10 = smov (!%p506_p11), 127   ;;  %s1171_s30 = smov (!%p506_p11), 1  }
 0x2a5   : > { %509 = sbr.rel (%p506_p11) target bundleno = 1307 (0x51b), region = 56 }
 0x2aa   : > { %v520_v38 = vld [vmem:[#allocation5] sm:$0x3]  ;;  %v522_v39 = vlaneseq  ;;  %v518_v40 = vld [vmem:[#allocation4] sm:$0x3]  ;;  %v1335_v46 = vld [vmem:[%s1510_s2 + $0x8] sm:$0xff]  ;;  %v1172_v25 = vmov 0  }
 0x2ab   : > { %v521_v41 = vmul.f32 0.001953125, %v520_v38  ;;  %v519_v45 = vmul.f32 0.001953125, %v518_v40  ;;  %v1340_v47 = vld [vmem:[%s1510_s2] sm:$0xff]  ;;  %v1349_v51 = vld [vmem:[%s1510_s2 + $0x10] sm:$0xff]  ;;  %v1358_v54 = vld [vmem:[%s1510_s2 + $0x18] sm:$0xff]  ;;  %1044 = vset.pattern.permute.xlu0 %v1172_v25  ;;  %1043 = vset.pattern.permute.xlu1 %v1172_v25  ;;  %vm793_vm9 = vcmask 9216  }
 0x2ac   : > { %v523_v42 = vshrl.u32 %v522_v39, 7  ;;  %v517_v25 = vld [vmem:[%s1511_s3 + $0x18] sm:$0xff]  ;;  %vm742_vm10 = vcmask 15360   ;;  %vm787_vm11 = vcmask 23568  }
 0x2ae   : > { %v524_v43 = vsub.s32 0, %v523_v42  ;;  %v548_v44 = vsub.s32 1, %v523_v42 }
 0x2b0   : > { %v1342_v48 = vrot.slane %v521_v41, %v524_v43  ;;  %v549_v49 = vrot.slane %v521_v41, %v548_v44  ;;  %v1344_v50 = vrot.slane %v519_v45, %v524_v43  ;;  %v589_v57 = vrot.slane %v519_v45, %v548_v44 }
 0x2b2   : > { %619 = vrot.lane.b32.xlu0 %v1342_v48, %s1170_s10  ;;  %v631_v52 = vmul.f32 %v549_v49, %v1335_v46  ;;  %v630_v53 = vmul.f32 %v549_v49, %v1340_v47  ;;  %v632_v55 = vmul.f32 %v549_v49, %v1349_v51  ;;  %v633_v56 = vmul.f32 %v549_v49, %v1358_v54 }
 0x2b3   : > { %v539_v31 = vmul.f32 %v1342_v48, %v1335_v46  ;;  %v538_v32 = vmul.f32 %v1342_v48, %v1340_v47  ;;  %v527_v34 = vmul.f32 %v1344_v50, %v1335_v46  ;;  %v526_v36 = vmul.f32 %v1344_v50, %v1340_v47 }
 0x2b4   : > { %640 = vrot.lane.b32.xlu1 %v631_v52, %s1170_s10  ;;  %v541_v39 = vmul.f32 %v1342_v48, %v1358_v54  ;;  %v540_v40 = vmul.f32 %v1342_v48, %v1349_v51  ;;  %v529_v42 = vmul.f32 %v1344_v50, %v1358_v54  ;;  %v528_v43 = vmul.f32 %v1344_v50, %v1349_v51 }
 0x2b6   : > { %638 = vrot.lane.b32.xlu0 %v630_v53, %s1170_s10 }
 0x2b8   : > { %642 = vrot.lane.b32.xlu1 %v632_v55, %s1170_s10 }
 0x2ba   : > { %644 = vrot.lane.b32.xlu0 %v633_v56, %s1170_s10 }
 0x2bc   : > { %551 = vrot.lane.b32.xlu1 %v549_v49, %s1171_s30 }
 0x2be   : > { %591 = vrot.lane.b32.xlu0 %v589_v57, %s1171_s30 }
 0x324   : > { %v620_v58 = vpop.permute.xlu0 %619 }
 0x325   : > { %v623_v59 = vmul.f32 %v620_v58, %v1335_v46  ;;  %v622_v62 = vmul.f32 %v620_v58, %v1340_v47  ;;  %v624_v3 = vmul.f32 %v620_v58, %v1349_v51  ;;  %v625_v4 = vmul.f32 %v620_v58, %v1358_v54 }
 0x326   : > { %v641_v60 = vpop.permute.xlu1 %640 }
 0x327   : > { %v651_v61 = vadd.f32 %v641_v60, %v623_v59 }
 0x328   : > { %v639_v63 = vpop.permute.xlu0 %638 }
 0x329   : > { %v650_v1 = vadd.f32 %v639_v63, %v622_v62  ;;  %660 = vrot.lane.b32.xlu0 %v651_v61, %s1171_s30 }
 0x32a   : > { %v643_v2 = vpop.permute.xlu1 %642 }
 0x32b   : > { %658 = vrot.lane.b32.xlu1 %v650_v1, %s1171_s30  ;;  %v652_v6 = vadd.f32 %v643_v2, %v624_v3 }
 0x32c   : > { %v645_v5 = vpop.permute.xlu0 %644 }
 0x32d   : > { %v653_v7 = vadd.f32 %v645_v5, %v625_v4 }
 0x32e   : > { %v552_v8 = vpop.permute.xlu1 %551 }
 0x32f   : > { %664 = vrot.lane.b32.xlu0 %v653_v7, %s1171_s30  ;;  %662 = vrot.lane.b32.xlu1 %v652_v6, %s1171_s30  ;;  %v555_v0 = vmul.f32 %v552_v8, %v1335_v46  ;;  %v554_v9 = vmul.f32 %v552_v8, %v1340_v47  ;;  %v557_v10 = vmul.f32 %v552_v8, %v1358_v54 }
 0x330   : > { %v556_v11 = vmul.f32 %v552_v8, %v1349_v51  ;;  %v592_v12 = vpop.permute.xlu0 %591 }
 0x331   : > { %v595_v13 = vmul.f32 %v592_v12, %v1335_v46  ;;  %v594_v14 = vmul.f32 %v592_v12, %v1340_v47  ;;  %v597_v15 = vmul.f32 %v592_v12, %v1358_v54  ;;  %v596_v16 = vmul.f32 %v592_v12, %v1349_v51 }
 0x333   : > { %564 = vrot.lane.b32.xlu0 %v555_v0, %s1170_s10  ;;  %562 = vrot.lane.b32.xlu1 %v554_v9, %s1170_s10 }
 0x337   : > { %568 = vrot.lane.b32.xlu0 %v557_v10, %s1170_s10  ;;  %566 = vrot.lane.b32.xlu1 %v556_v11, %s1170_s10 }
 0x33b   : > { %604 = vrot.lane.b32.xlu0 %v595_v13, %s1170_s10  ;;  %602 = vrot.lane.b32.xlu1 %v594_v14, %s1170_s10 }
 0x33f   : > { %608 = vrot.lane.b32.xlu0 %v597_v15, %s1170_s10  ;;  %606 = vrot.lane.b32.xlu1 %v596_v16, %s1170_s10 }
 0x39b   : > { %v661_v17 = vpop.permute.xlu0 %660 }
 0x39c   : > { %v671_v18 = vmul.f32 %v661_v17, %v1335_v46 }
 0x39d   : > { %v659_v19 = vpop.permute.xlu1 %658 }
 0x39e   : > { %v670_v20 = vmul.f32 %v659_v19, %v1340_v47  ;;  %680 = vrot.lane.b32.xlu0 %v671_v18, %s1170_s10  ;;  %v515_v18 = vld [vmem:[%s1511_s3 + $0x8] sm:$0xff] }
 0x3a0   : > { %678 = vrot.lane.b32.xlu1 %v670_v20, %s1170_s10  ;;  %v514_v20 = vld [vmem:[%s1511_s3] sm:$0xff] }
 0x3a1   : > { %v665_v21 = vpop.permute.xlu0 %664  ;;  %v663_v22 = vpop.permute.xlu1 %662 }
 0x3a2   : > { %v673_v23 = vmul.f32 %v665_v21, %v1358_v54  ;;  %v672_v24 = vmul.f32 %v663_v22, %v1349_v51 }
 0x3a4   : > { %684 = vrot.lane.b32.xlu0 %v673_v23, %s1170_s10  ;;  %682 = vrot.lane.b32.xlu1 %v672_v24, %s1170_s10 }
 0x3a5   : > { %v565_v26 = vpop.permute.xlu0 %564  ;;  %v563_v27 = vpop.permute.xlu1 %562 }
 0x3a6   : > { %v575_v35 = vadd.f32 %v565_v26, %v539_v31  ;;  %v574_v37 = vadd.f32 %v563_v27, %v538_v32  ;;  %v516_v27 = vld [vmem:[%s1511_s3 + $0x10] sm:$0xff] }
 0x3a8   : > { %v579_v49 = vmul.f32 %v575_v35, %v1335_v46  ;;  %v578_v53 = vmul.f32 %v574_v37, %v1340_v47 }
 0x3a9   : > { %v569_v28 = vpop.permute.xlu0 %568  ;;  %v567_v29 = vpop.permute.xlu1 %566 }
 0x3aa   : > { %v577_v55 = vadd.f32 %v569_v28, %v541_v39  ;;  %v576_v56 = vadd.f32 %v567_v29, %v540_v40 }
 0x3ac   : > { %v581_v50 = vmul.f32 %v577_v55, %v1358_v54  ;;  %v580_v3 = vmul.f32 %v576_v56, %v1349_v51 }
 0x3ad   : > { %v605_v30 = vpop.permute.xlu0 %604  ;;  %v603_v33 = vpop.permute.xlu1 %602 }
 0x3ae   : > { %v615_v41 = vadd.f32 %v605_v30, %v527_v34  ;;  %v614_v45 = vadd.f32 %v603_v33, %v526_v36  ;;  %v792_v34 = vld [vmem:[#allocation6] sm:$0x3] }
 0x3af   : > { %794 = vst.msk [vmem:[%s248_s25] sm:$0x3] %vm793_vm9, %v792_v34 }
 0x3b0   : > { %v695_v57 = vmul.f32 %v615_v41, %v615_v41  ;;  %v694_v61 = vmul.f32 %v614_v45, %v614_v45 }
 0x3b1   : > { %v609_v38 = vpop.permute.xlu0 %608  ;;  %v607_v44 = vpop.permute.xlu1 %606 }
 0x3b2   : > { %v617_v59 = vadd.f32 %v609_v38, %v529_v42  ;;  %v616_v48 = vadd.f32 %v607_v44, %v528_v43 }
 0x3b4   : > { %v697_v4 = vmul.f32 %v617_v59, %v617_v59  ;;  %v696_v5 = vmul.f32 %v616_v48, %v616_v48 }
 0x410   : > { %v681_v52 = vpop.permute.xlu0 %680 }
 0x411   : > { %v691_v58 = vadd.f32 %v681_v52, %v579_v49 }
 0x412   : > { %v679_v60 = vpop.permute.xlu1 %678 }
 0x413   : > { %v699_v62 = vsub.f32 %v691_v58, %v695_v57  ;;  %v690_v63 = vadd.f32 %v679_v60, %v578_v53 }
 0x415   : > { %v703_v1 = vmax.f32 %v699_v62, 0.0  ;;  %v698_v2 = vsub.f32 %v690_v63, %v694_v61 }
 0x416   : > { %v685_v6 = vpop.permute.xlu0 %684  ;;  %v683_v7 = vpop.permute.xlu1 %682 }
 0x417   : > { %v707_v8 = vadd.f32 1e-05, %v703_v1  ;;  %v702_v0 = vmax.f32 %v698_v2, 0.0  ;;  %v693_v9 = vadd.f32 %v685_v6, %v581_v50  ;;  %v692_v10 = vadd.f32 %v683_v7, %v580_v3 }
 0x419   : > { %1045 = vrsqrt.f32 %v707_v8  ;;  %v706_v11 = vadd.f32 1e-05, %v702_v0  ;;  %v701_v12 = vsub.f32 %v693_v9, %v697_v4  ;;  %v700_v13 = vsub.f32 %v692_v10, %v696_v5 }
 0x41b   : > { %1047 = vrsqrt.f32 %v706_v11  ;;  %v705_v14 = vmax.f32 %v701_v12, 0.0  ;;  %v704_v15 = vmax.f32 %v700_v13, 0.0 }
 0x41d   : > { %v709_v16 = vadd.f32 1e-05, %v705_v14  ;;  %v708_v17 = vadd.f32 1e-05, %v704_v15 }
 0x41f   : > { %1049 = vrsqrt.f32 %v709_v16 }
 0x420   : > { %1051 = vrsqrt.f32 %v708_v17 }
 0x426   : > { %v1046_v19 = vpop.eup %1045 }
 0x427   : > { %v715_v21 = vmul.f32 %v1046_v19, %v515_v18 }
 0x428   : > { %v1048_v22 = vpop.eup %1047 }
 0x429   : > { %v748_v23 = vmul.f32 %v715_v21, %v615_v41  ;;  %v714_v24 = vmul.f32 %v1048_v22, %v514_v20 }
 0x42b   : > { %757 = vrot.lane.b32.xlu0 %v748_v23, %s1171_s30  ;;  %v747_v26 = vmul.f32 %v714_v24, %v614_v45 }
 0x42c   : > { %v1050_v28 = vpop.eup %1049 }
 0x42d   : > { %v1052_v29 = vpop.eup %1051  ;;  %755 = vrot.lane.b32.xlu1 %v747_v26, %s1171_s30  ;;  %v717_v30 = vmul.f32 %v1050_v28, %v517_v25 }
 0x42e   : > { %v716_v31 = vmul.f32 %v1052_v29, %v516_v27 }
 0x42f   : > { %v750_v32 = vmul.f32 %v717_v30, %v617_v59 }
 0x430   : > { %v749_v33 = vmul.f32 %v716_v31, %v616_v48 }
 0x431   : > { %761 = vrot.lane.b32.xlu0 %v750_v32, %s1171_s30 }
 0x432   : > { %759 = vrot.lane.b32.xlu1 %v749_v33, %s1171_s30 }
 0x435   : > { %725 = vperm.xlu0 %1044, %v715_v21  }
 0x436   : > { %720 = vperm.xlu1 %1043, %v714_v24  }
 0x43a   : > { %730 = vperm.xlu1 %1043, %v716_v31  }
 0x43e   : > { %735 = vperm.xlu1 %1043, %v717_v30  }
 0x49d   : > { %v758_v35 = vpop.permute.xlu0 %757 }
 0x49e   : > { %v768_v36 = vsub.f32 %v515_v18, %v758_v35 }
 0x49f   : > { %v756_v37 = vpop.permute.xlu1 %755 }
 0x4a0   : > { %v767_v38 = vsub.f32 %v514_v20, %v756_v37  ;;  %777 = vrot.lane.b32.xlu1 %v768_v36, %s1171_s30 }
 0x4a2   : > { %775 = vrot.lane.b32.xlu0 %v767_v38, %s1171_s30 }
 0x4a3   : > { %v762_v39 = vpop.permute.xlu0 %761 }
 0x4a4   : > { %v770_v40 = vsub.f32 %v517_v25, %v762_v39  ;;  %v760_v41 = vpop.permute.xlu1 %759 }
 0x4a5   : > { %v769_v42 = vsub.f32 %v516_v27, %v760_v41 }
 0x4a6   : > { %781 = vrot.lane.b32.xlu1 %v770_v40, %s1171_s30 }
 0x4a7   : > { %779 = vrot.lane.b32.xlu0 %v769_v42, %s1171_s30 }
 0x4b0   : > { %v726_v43 = vpop.permute.xlu0 %725 }
 0x4b1   : > { %v739_v44 = vmul.f32 %v726_v43, %v1335_v46  ;;  %v721_v45 = vpop.permute.xlu1 %720 }
 0x4b2   : > { %v738_v49 = vmul.f32 %v721_v45, %v1340_v47 }
 0x4b3   : > { %744 = vst.msk [vmem:[%s1298_s7 + $0x8] sm:$0xff] %vm742_vm10, %v739_v44 }
 0x4b4   : > { %743 = vst.msk [vmem:[%s1298_s7] sm:$0xff] %vm742_vm10, %v738_v49 }
 0x4b5   : > { %v731_v52 = vpop.permute.xlu1 %730 }
 0x4b6   : > { %v740_v53 = vmul.f32 %v731_v52, %v1349_v51 }
 0x4b8   : > { %745 = vst.msk [vmem:[%s1298_s7 + $0x10] sm:$0xff] %vm742_vm10, %v740_v53 }
 0x4b9   : > { %v736_v55 = vpop.permute.xlu1 %735 }
 0x4ba   : > { %v741_v56 = vmul.f32 %v736_v55, %v1358_v54 }
 0x4bc   : > { %746 = vst.msk [vmem:[%s1298_s7 + $0x18] sm:$0xff] %vm742_vm10, %v741_v56 }
 0x512   : > { %v778_v57 = vpop.permute.xlu1 %777 }
 0x513   : > { %789 = vst.msk [vmem:[%s1298_s7 + $0x8] sm:$0xff] %vm787_vm11, %v778_v57 }
 0x514   : > { %v776_v58 = vpop.permute.xlu0 %775 }
 0x515   : > { %788 = vst.msk [vmem:[%s1298_s7] sm:$0xff] %vm787_vm11, %v776_v58 }
 0x518   : > { %v782_v46 = vpop.permute.xlu1 %781 }
 0x519   : > { %v780_v59 = vpop.permute.xlu0 %779  ;;  %791 = vst.msk [vmem:[%s1298_s7 + $0x18] sm:$0xff] %vm787_vm11, %v782_v46 }
 0x51a   : > { %790 = vst.msk [vmem:[%s1298_s7 + $0x10] sm:$0xff] %vm787_vm11, %v780_v59 }
 0x51b PF: > { %s938_s22 = sshll.u32 %s1145_s23, 5  ;;  %s814_s30 = sshll.u32 %s248_s25, 4  ;;  %s815_s30 = int_to_ptr.vmem [resolvable:$true] %s814_s30 }
 0x51c   : > { %s812_s26 = scalar_lea.hbm %s1512_s4, %s938_s22  ;;  %s1525_s6 = sand.u32 1, %s1129_s19  }
 0x51d   : > { %s796_s13 = scalar_lea.sflag [#allocation8], %s1525_s6  ;;  %s1053_s14 = scalar_lea.vmem %s815_s30, 32 }
 0x51e   : > { %p1054_p12 = scmp.ne.s32.totalorder %s815_s30, %s1053_s14  ;;  %s1173_s7 = smov [#allocation7]  }
 0x51f   : > { %s1057_s16 = sshll.u32 %s1173_s7, 4  ;;  %s1058_s16 = int_to_ptr.vmem [resolvable:$false] %s1057_s16 }
 0x520   : > { %p1055_p13 = pnand %p1054_p12, %p1266_p6  ;;  %s1059_s17 = scalar_lea.vmem %s1058_s16, 64 }
 0x521   : > { %p1060_p1 = scmp.lt.s32.totalorder %s815_s30, %s1058_s16  ;;  %p1061_p2 = scmp.lt.s32.totalorder %s1059_s17, %s1053_s14 }
 0x522   : > { %p1056_p0 = pneg %p1055_p13 }
 0x523   : > { %p1062_p3 = por %p1061_p2, %p1060_p1 }
 0x525   : > { %p1063_p4 = pnand %p1062_p3, %p1056_p0 }
 0x527   : > { %1066 = shalt.err (!%p1063_p4)
}
 0x528   : > { %s1067_s23 = scalar_lea.hbm %s812_s26, 32  ;;  %s1071_s28 = scalar_lea.hbm %s1512_s4, 64 }
 0x529   : > { %p1068_p5 = scmp.ne.s32.totalorder %s812_s26, %s1067_s23  ;;  %p1072_p10 = scmp.lt.s32.totalorder %s812_s26, %s1512_s4 }
 0x52a   : > { %p1073_p11 = scmp.lt.s32.totalorder %s1071_s28, %s1067_s23 }
 0x52b   : > { %p1069_p7 = pnand %p1068_p5, %p1266_p6 }
 0x52c   : > { %p1074_p12 = por %p1073_p11, %p1072_p10 }
 0x52d   : > { %p1070_p9 = pneg %p1069_p7 }
 0x52f   : > { %p1075_p13 = pnand %p1074_p12, %p1070_p9 }
 0x531   : > { %1078 = shalt.err (!%p1075_p13)
}
 0x532   : > { %942 = dma.vmem_to_hbm [thread:$0]  (%p1266_p6), %s815_s30, 32, %s812_s26, %s796_s13  }
 0x533 PF: > { %p948_p0 = scmp.ge.s32.totalorder %s1161_s27, 2  ;;  %s829_s22 = sand.u32 1, %s1125_s18  }
 0x534   : > { %s830_s10 = scalar_lea.sflag [#allocation8], %s829_s22 }
 0x535   : > { %p945_p1 = pnand %p948_p0, %p1274_p8 }
 0x537   : > { %p946_p2 = pneg %p945_p1 }
 0x539   : > { %1120 = dma.done.wait (%p946_p2), %s830_s10, 32  }
 0x53a   : > { %1122 = vsyncadd (%p946_p2), %s830_s10, 4294967264  ;;  %s19_s27 = sadd.s32 1, %s1161_s27   ;;  %s1526_s22 = sld [smem:[#allocation10_spill]] }
 0x53b   : > { %p16_p3 = scmp.ge.s32.totalorder %s19_s27, 10   ;;  %s1527_s23 = sld [smem:[#allocation11_spill]] }
 0x53c   : > { %s1528_s8 = sld [smem:[#allocation12_spill]]  ;;  %s1531_s18 = smov %s1129_s19 }
 0x53d   : > { %s1529_s25 = sld [smem:[#allocation13_spill]]  ;;  %s1532_s19 = smov %s1133_s20 }
 0x53e   : > { %s1530_s26 = sld [smem:[#allocation14_spill]]  ;;  %s1533_s20 = smov %s1285_s12 }
 0x53f   : > { %s1534_s21 = smov %s1149_s24  ;;  %18 = sbr.rel (!%p16_p3) target bundleno = 6 (0x6), region = 103 }
 0x542   : > { %s1535_s24 = smov %s1528_s8 }
 0x544   :  { %843 = vsyncpa [#allocation8], 1 }
 0x545   :  { %845 = vsyncpa [#allocation8 + $0x1], 1 }

</bundles_post_ra>
